<compile_context>
chip_gen: v7x
topology: tpu7x:2x2x1
jax: 0.10.0
libtpu: 0.0.40
codegen_flags: <defaults>
</compile_context>

<pallas_src>
import jax
import jax.numpy as jnp
from jax.experimental import pallas as pl
from jax.experimental.pallas import tpu as pltpu


def _round_up(x, m):
    return (x + m - 1) // m * m


def _cdiv(a, b):
    return (a + b - 1) // b


def _vmem_budget_bytes():
    """Usable scoped-VMEM budget with headroom (generation aware)."""
    try:
        cap = int(pltpu.get_tpu_info().vmem_capacity_bytes)
    except Exception:
        cap = 64 << 20  # conservative fallback: v7x per-core VMEM
    return max(32 << 20, min(int(cap * 0.85), cap - (8 << 20)))


def _pick_tile(dim, max_tile):
    """128-multiple tile <= max_tile minimizing padded size; prefers
    256-multiples (full v6e/v7x MXU passes) and larger tiles when the padding
    cost is comparable."""
    dim128 = _round_up(dim, 128)
    if dim128 <= max_tile:
        return dim128
    cands = list(range(128, max_tile + 1, 128))
    best_pad = min(_round_up(dim128, t) for t in cands)
    ok = [t for t in cands if _round_up(dim128, t) <= best_pad * 1.05]
    ok.sort(key=lambda t: (0 if t % 256 == 0 else 1, -t))
    return ok[0]


# --------------------------- kernels -----------------------------------------


def _wres_kernel(x_ref, w_ref, b_ref, o_ref):
    # Weight-resident: full K and N per step; fused bias + ReLU.
    acc = jnp.dot(x_ref[...], w_ref[...], preferred_element_type=jnp.float32)
    o_ref[...] = jnp.maximum(acc + b_ref[...], 0.0).astype(o_ref.dtype)


def _tiled_f32_kernel(x_ref, w_ref, b_ref, o_ref):
    # f32 output: accumulate directly into the resident output block.
    k = pl.program_id(2)
    part = jnp.dot(x_ref[...], w_ref[...], preferred_element_type=jnp.float32)

    @pl.when(k == 0)
    def _():
        o_ref[...] = part

    @pl.when(k > 0)
    def _():
        o_ref[...] += part

    @pl.when(k == pl.num_programs(2) - 1)
    def _():
        o_ref[...] = jnp.maximum(o_ref[...] + b_ref[...], 0.0)


def _tiled_acc_kernel(x_ref, w_ref, b_ref, o_ref, acc_ref):
    # Sub-f32 output: keep a separate f32 accumulator.
    k = pl.program_id(2)
    part = jnp.dot(x_ref[...], w_ref[...], preferred_element_type=jnp.float32)

    @pl.when(k == 0)
    def _():
        acc_ref[...] = part

    @pl.when(k > 0)
    def _():
        acc_ref[...] += part

    @pl.when(k == pl.num_programs(2) - 1)
    def _():
        o_ref[...] = jnp.maximum(acc_ref[...] + b_ref[...], 0.0).astype(o_ref.dtype)


# --------------------------- wrapper ------------------------------------------


def dense_l(x, w, b, *, tile_b=None, tile_n=None, tile_k=None):
    """Fused Linear + ReLU: y = relu(x @ w + b).

    x: [B, in_size]   w: [in_size, out_size] (PyTorch weight transposed)
    b: [out_size]
    """
    B, K = x.shape
    Kw, N = w.shape
    assert K == Kw and b.shape == (N,)
    dtype = x.dtype
    itemsize = jnp.dtype(dtype).itemsize
    b2d = b.reshape(1, N)
    budget = _vmem_budget_bytes()

    user_tiled = not (tile_b is None and tile_n is None and tile_k is None)

    # ---------------- Path A: weight-resident fast path ----------------------
    if not user_tiled:
        tb = B if B <= 256 else 256
        # Give both v7x TensorCores parallel work when there is enough batch.
        if B >= 64 and _cdiv(B, tb) < 2:
            tb = max(8, _round_up(_cdiv(B, 2), 8))
        resident = 2 * (tb * K + K * N + N + tb * N) * itemsize
        if resident <= int(0.75 * budget):
            n_b = _cdiv(B, tb)
            cost = pl.CostEstimate(
                flops=2 * (n_b * tb) * K * N,
                transcendentals=0,
                bytes_accessed=(n_b * tb * K + K * N + N + n_b * tb * N) * itemsize,
            )
            return pl.pallas_call(
                _wres_kernel,
                out_shape=jax.ShapeDtypeStruct((B, N), dtype),
                grid_spec=pltpu.PrefetchScalarGridSpec(
                    num_scalar_prefetch=0,
                    grid=(n_b,),
                    in_specs=[
                        pl.BlockSpec((tb, K), lambda i: (i, 0)),
                        pl.BlockSpec((K, N), lambda i: (0, 0)),
                        pl.BlockSpec((1, N), lambda i: (0, 0)),
                    ],
                    out_specs=pl.BlockSpec((tb, N), lambda i: (i, 0)),
                ),
                compiler_params=pltpu.CompilerParams(
                    dimension_semantics=("parallel",),
                    vmem_limit_bytes=int(
                        min(max(resident + (2 << 20), 16 << 20), budget)
                    ),
                ),
                cost_estimate=cost,
            )(x, w, b2d)

    # ---------------- Path B: general tiled matmul ---------------------------
    K128 = _round_up(K, 128)
    N128 = _round_up(N, 128)

    if tile_b is None:
        tb = 512 if B >= 1024 else min(_round_up(B, 8), 256)
    else:
        tb = min(_round_up(tile_b, 8), _round_up(B, 8))
    if tile_k is None:
        tk = _pick_tile(K, 1024)
    else:
        tk = min(_round_up(tile_k, 128), K128)
    if tile_n is None:
        tn = _pick_tile(N, 1024)
    else:
        tn = min(_round_up(tile_n, 128), N128)

    # Ensure the parallel part of the grid has >= 2 programs (v7x megacore).
    if _cdiv(B, tb) * _cdiv(N, tn) < 2 and B >= 64:
        tb = max(8, _round_up(_cdiv(B, 2), 8))

    # Only K strictly requires zero padding (garbage in a tail-K block would
    # contaminate every output); B and N use Pallas partial blocks instead.
    Kp = _round_up(K, tk)
    xp = jnp.pad(x, ((0, 0), (0, Kp - K))) if Kp != K else x
    wp = jnp.pad(w, ((0, Kp - K), (0, 0))) if Kp != K else w

    grid = (_cdiv(B, tb), _cdiv(N, tn), Kp // tk)

    out_is_f32 = jnp.dtype(dtype) == jnp.float32
    kernel = _tiled_f32_kernel if out_is_f32 else _tiled_acc_kernel
    scratch = [] if out_is_f32 else [pltpu.VMEM((tb, tn), jnp.float32)]

    vmem_bytes = (
        2 * (tb * tk + tk * tn + tn + tb * tn) * itemsize
        + (0 if out_is_f32 else tb * tn * 4)
        + (2 << 20)  # headroom
    )
    vmem_bytes = int(min(max(vmem_bytes, 16 << 20), budget))

    Be, Ne = grid[0] * tb, grid[1] * tn  # dims actually executed
    cost = pl.CostEstimate(
        flops=2 * Be * Kp * Ne,
        transcendentals=0,
        bytes_accessed=(Be * Kp + Kp * Ne + Ne + Be * Ne) * itemsize,
    )

    return pl.pallas_call(
        kernel,
        out_shape=jax.ShapeDtypeStruct((B, N), dtype),
        grid_spec=pltpu.PrefetchScalarGridSpec(
            num_scalar_prefetch=0,
            grid=grid,
            in_specs=[
                pl.BlockSpec((tb, tk), lambda i, j, k: (i, k)),
                pl.BlockSpec((tk, tn), lambda i, j, k: (k, j)),
                pl.BlockSpec((1, tn), lambda i, j, k: (0, j)),
            ],
            out_specs=pl.BlockSpec((tb, tn), lambda i, j, k: (i, j)),
            scratch_shapes=scratch,
        ),
        compiler_params=pltpu.CompilerParams(
            dimension_semantics=("parallel", "parallel", "arbitrary"),
            vmem_limit_bytes=vmem_bytes,
        ),
        cost_estimate=cost,
    )(xp, wp, b2d)


if __name__ == "__main__":
    key = jax.random.PRNGKey(0)

    # ---- small shapes implied by the module: Linear(in, out) on [B, in] -----
    B, in_size, out_size = 8, 32, 32
    kx, kw, kb = jax.random.split(key, 3)
    bound = 1.0 / jnp.sqrt(in_size)
    x = jax.random.normal(kx, (B, in_size), dtype=jnp.float32)
    # PyTorch stores weight as [out, in]; we store its transpose [in, out].
    w = jax.random.uniform(kw, (in_size, out_size), minval=-bound, maxval=bound,
                           dtype=jnp.float32)
    b = jax.random.uniform(kb, (out_size,), minval=-bound, maxval=bound,
                           dtype=jnp.float32)

    out = jax.block_until_ready(dense_l(x, w, b))
    ref = jnp.maximum(x @ w + b[None, :], 0.0)
    assert out.shape == (B, out_size)
    assert jnp.allclose(out, ref, atol=1e-5, rtol=1e-5)

    # ---- larger case: exercises the weight-resident path (no K loop, no pad)
    B2, K2, N2 = 512, 640, 640
    k2x, k2w, k2b = jax.random.split(jax.random.PRNGKey(1), 3)
    bound2 = 1.0 / jnp.sqrt(K2)
    x2 = jax.random.normal(k2x, (B2, K2), dtype=jnp.float32)
    w2 = jax.random.uniform(k2w, (K2, N2), minval=-bound2, maxval=bound2,
                            dtype=jnp.float32)
    b2 = jax.random.uniform(k2b, (N2,), minval=-bound2, maxval=bound2,
                            dtype=jnp.float32)
    out2 = jax.block_until_ready(dense_l(x2, w2, b2))
    ref2 = jnp.maximum(x2 @ w2 + b2[None, :], 0.0)
    assert out2.shape == (B2, N2)
    assert jnp.allclose(out2, ref2, atol=1e-4, rtol=1e-4)

    # ---- force the general tiled path (partial B/N blocks + minimal K pad) --
    out3 = jax.block_until_ready(
        dense_l(x2, w2, b2, tile_b=256, tile_n=256, tile_k=256))
    assert jnp.allclose(out3, ref2, atol=1e-4, rtol=1e-4)

    # TODO(synk): strict f32 parity with PyTorch would need
    # precision=lax.Precision.HIGHEST; default MXU precision passes 1e-4/1e-5.
    print("KERNEL_OK")
</pallas_src>

<mosaic_0001>
module attributes {stable_mosaic.version = 11 : i64} {
  func.func @_wres_kernel(%arg0: i32, %arg1: memref<8x32xf32, #tpu.memory_space<vmem>>, %arg2: memref<32x32xf32, #tpu.memory_space<vmem>>, %arg3: memref<1x32xf32, #tpu.memory_space<vmem>>, %arg4: memref<8x32xf32, #tpu.memory_space<vmem>>) attributes {dimension_semantics = [#tpu.dimension_semantics<parallel>], iteration_bounds = array<i64: 1>, scalar_prefetch = 0 : i64, scratch_operands = 0 : i64, tpu.core_type = #tpu.core_type<tc>, window_params = [{transform_indices = @transform_0, window_bounds = array<i64: 8, 32>}, {pipeline_mode = #tpu.pipeline_mode<synchronous>, transform_indices = @transform_1, window_bounds = array<i64: 32, 32>}, {pipeline_mode = #tpu.pipeline_mode<synchronous>, transform_indices = @transform_2, window_bounds = array<i64: 1, 32>}, {transform_indices = @transform_3, window_bounds = array<i64: 8, 32>}]} {
    %c0 = arith.constant 0 : index
    %c0_0 = arith.constant 0 : index
    %0 = vector.load %arg1[%c0, %c0_0] : memref<8x32xf32, #tpu.memory_space<vmem>>, vector<8x32xf32>
    %c0_1 = arith.constant 0 : index
    %c0_2 = arith.constant 0 : index
    %1 = vector.load %arg2[%c0_1, %c0_2] : memref<32x32xf32, #tpu.memory_space<vmem>>, vector<32x32xf32>
    %cst = arith.constant dense<0.000000e+00> : vector<8x32xf32>
    %2 = tpu.matmul %0, %1, %cst {dimension_numbers = #tpu.dot_dimension_numbers<[1], [0], [0], [1], [0, 0, 1, 1], [], []>} : vector<8x32xf32>, vector<32x32xf32>, vector<8x32xf32> -> vector<8x32xf32>
    %c0_3 = arith.constant 0 : index
    %c0_4 = arith.constant 0 : index
    %3 = vector.load %arg3[%c0_3, %c0_4] : memref<1x32xf32, #tpu.memory_space<vmem>>, vector<1x32xf32>
    %4 = vector.broadcast %3 : vector<1x32xf32> to vector<8x32xf32>
    %5 = arith.addf %2, %4 : vector<8x32xf32>
    %cst_5 = arith.constant 0.000000e+00 : f32
    %6 = vector.broadcast %cst_5 : f32 to vector<8x32xf32>
    %7 = arith.maximumf %5, %6 : vector<8x32xf32>
    %c0_6 = arith.constant 0 : index
    %c0_7 = arith.constant 0 : index
    %8 = vector.load %arg4[%c0_6, %c0_7] : memref<8x32xf32, #tpu.memory_space<vmem>>, vector<8x32xf32>
    tpu.vector_store %arg4[%c0_6, %c0_7], %7 {strides = array<i32>} : memref<8x32xf32, #tpu.memory_space<vmem>>, vector<8x32xf32>,
    return
  }
  func.func @transform_0(%arg0: i32) -> (i32, i32) {
    %c0_i32 = arith.constant 0 : i32
    %c0_i32_0 = arith.constant 0 : i32
    return %arg0, %c0_i32 : i32, i32
  }
  func.func @transform_1(%arg0: i32) -> (i32, i32) {
    %c0_i32 = arith.constant 0 : i32
    %c0_i32_0 = arith.constant 0 : i32
    %c0_i32_1 = arith.constant 0 : i32
    return %c0_i32, %c0_i32_0 : i32, i32
  }
  func.func @transform_2(%arg0: i32) -> (i32, i32) {
    %c0_i32 = arith.constant 0 : i32
    %c0_i32_0 = arith.constant 0 : i32
    %c0_i32_1 = arith.constant 0 : i32
    return %c0_i32, %c0_i32_0 : i32, i32
  }
  func.func @transform_3(%arg0: i32) -> (i32, i32) {
    %c0_i32 = arith.constant 0 : i32
    %c0_i32_0 = arith.constant 0 : i32
    return %arg0, %c0_i32 : i32, i32
  }
}

</mosaic_0001>

<bundles_post_ra>
// kernel: tpu_custom_call.1
= control target key start
LH: loop header
LB: loop body
LE: loop exit
PB: predicated region body
PF: predicated region fallthrough
CT: control target
= control target key end

     0   :  { %8 = vsyncpa [#allocation3], 0  ;;  %s323_s0 = inlined_call_operand.hbm [shape: f32[8,32], index: 0, kind: input, shape index: {}]   ;;  %s324_s1 = inlined_call_operand.hbm [shape: f32[32,32], index: 1, kind: input, shape index: {}]   ;;  %s325_s2 = inlined_call_operand.vmem [shape: f32[1,32], index: 2, kind: input, shape index: {}]   ;;  %s326_s3 = inlined_call_operand.hbm [shape: f32[8,32], index: 3, kind: output, shape index: {}]  }
   0x1   :  { %9 = vsyncpa [#allocation6], 0 }
   0x2   :  { %10 = vsyncpa [#allocation4], 0  ;;  %s249_s12 = smov [#allocation2]   ;;  %s250_s14 = smov [#allocation5]  }
   0x3   :  { %s17_s13 = sshll.u32 %s249_s12, 4  ;;  %s26_s15 = sshll.u32 %s250_s14, 4  ;;  %s18_s13 = int_to_ptr.vmem [resolvable:$true] %s17_s13  ;;  %s277_s15 = int_to_ptr.vmem [resolvable:$true] %s26_s15 }
   0x4   :  { %s177_s18 = scalar_lea.hbm %s323_s0, 128 }
   0x5   :  { %p178_p0 = scmp.ne.s32.totalorder %s323_s0, %s177_s18  ;;  %p181_p1 = scmp.lt.u32.totalorder %s177_s18, %s323_s0 }
   0x7   :  { %p183_p2 = pnand %p181_p1, %p178_p0 }
   0x9   :  { %186 = shalt.err (!%p183_p2)
}
   0xa   :  { %s187_s23 = scalar_lea.vmem %s18_s13, 128  ;;  %p192_p4 = scmp.lt.s32.totalorder %s18_s13, %s18_s13 }
   0xb   :  { %p188_p3 = scmp.ne.s32.totalorder %s18_s13, %s187_s23  ;;  %p193_p5 = scmp.lt.s32.totalorder %s187_s23, %s187_s23 }
   0xd   :  { %p194_p6 = por %p193_p5, %p192_p4 }
   0xf   :  { %p195_p7 = pnand %p194_p6, %p188_p3 }
  0x11   :  { %198 = shalt.err (!%p195_p7)
}
  0x12   :  { %20 = dma.hbm_to_vmem [thread:$0]  %s323_s0, 128, %s18_s13, [#allocation3]  }
  0x13   :  { %s199_s28 = scalar_lea.hbm %s324_s1, 512 }
  0x14   :  { %p200_p8 = scmp.ne.s32.totalorder %s324_s1, %s199_s28  ;;  %p203_p9 = scmp.lt.u32.totalorder %s199_s28, %s324_s1 }
  0x16   :  { %p205_p10 = pnand %p203_p9, %p200_p8 }
  0x18   :  { %208 = shalt.err (!%p205_p10)
}
  0x19   :  { %s209_s6 = scalar_lea.vmem %s277_s15, 512  ;;  %p214_p12 = scmp.lt.s32.totalorder %s277_s15, %s277_s15 }
  0x1a   :  { %p210_p11 = scmp.ne.s32.totalorder %s277_s15, %s209_s6  ;;  %p215_p13 = scmp.lt.s32.totalorder %s209_s6, %s209_s6 }
  0x1c   :  { %p216_p0 = por %p215_p13, %p214_p12 }
  0x1e   :  { %p217_p1 = pnand %p216_p0, %p210_p11 }
  0x20   :  { %220 = shalt.err (!%p217_p1)
}
  0x21   :  { %s251_s0 = smov 128   ;;  %s252_s7 = smov 8  }
  0x22   :  { %32 = dma.hbm_to_vmem [thread:$0]  %s324_s1, 512, %s277_s15, [#allocation6], %s251_s0, %s251_s0, %s252_s7  }
  0x23   :  { %243 = dma.done.wait [#allocation3], 128  }
  0x24   :  { %244 = vsyncadd [#allocation3], 4294967168 }
  0x25   :  { %245 = dma.done.wait [#allocation6], 512  }
  0x26   :  { %246 = vsyncadd [#allocation6], 4294966784  ;;  %v253_v0 = vmov 0.0|0.0   ;;  %vm254_vm0 = vmmov 0   ;;  %v255_v1 = vmov 0.0   ;;  %v42_v2 = vld [vmem:[#allocation5] sm:$0xff] }
  0x27   :  { %163 = vmatprep.subr.bf16.mxu0 %v253_v0  ;;  %160 = vmatprep.mubr.msk.f32.mxu0 %vm254_vm0, %v255_v1  ;;  %v43_v3 = vld [vmem:[#allocation5 + $0x8] sm:$0xff]  ;;  %v44_v4 = vld [vmem:[#allocation5 + $0x10] sm:$0xff]  ;;  %v45_v6 = vld [vmem:[#allocation5 + $0x18] sm:$0xff]  ;;  %vm53_vm1 = vcmask 261120   ;;  %s256_s11 = smov [#allocation7]  }
  0x28   :  { %v164_v5 = vpack.c.bf16 %v43_v3, %v42_v2  ;;  %v167_v7 = vpack.c.bf16 %v45_v6, %v44_v4  ;;  %v41_v8 = vld [vmem:[#allocation2] sm:$0xff]  ;;  %s135_s12 = sshll.u32 %s256_s11, 4  ;;  %s136_s12 = int_to_ptr.vmem [resolvable:$true] %s135_s12 }
  0x29   :  { %v145_v9 = vld [vmem:[%s325_s2] ss:$0 sm:$0xff]  ;;  %s221_s13 = scalar_lea.vmem %s136_s12, 128  ;;  %p226_p3 = scmp.lt.s32.totalorder %s136_s12, %s136_s12 }
  0x2a   :  { %165 = vmatpush3.bf16.msra.mxu0 %v164_v5  ;;  %p222_p2 = scmp.ne.s32.totalorder %s136_s12, %s221_s13  ;;  %p227_p4 = scmp.lt.s32.totalorder %s221_s13, %s221_s13 }
  0x2b   :  { %166 = vmatprep.subr.bf16.mxu0 %v253_v0 }
  0x2c   :  { %p228_p5 = por %p227_p4, %p226_p3 }
  0x2e   :  { %168 = vmatpush3.bf16.msra.mxu0 %v167_v7  ;;  %p229_p6 = pnand %p228_p5, %p222_p2 }
  0x31   :  { %161 = vmatmul.mubr.msk.f32.vlgmr.msra.gmra.mrb[0].mxu0 %vm53_vm1, %v41_v8 }
 0x104   :  { %v123_v10 = vpop.f32.mrb[0].mxu0 }
 0x105   :  { %v124_v11 = vadd.f32 %v145_v9, %v123_v10  ;;  %v162_v12 = vpop.f32.mrb[1].mxu0 }
 0x107   :  { %v127_v13 = vmax.f32 %v124_v11, 0.0 }
 0x109   :  { %128 = vst.msk [vmem:[#allocation7] sm:$0xff] %vm53_vm1, %v127_v13 }
 0x10a   :  { %232 = shalt.err (!%p229_p6)
}
 0x10b   :  { %s233_s16 = scalar_lea.hbm %s326_s3, 128 }
 0x10c   :  { %p234_p7 = scmp.ne.s32.totalorder %s326_s3, %s233_s16  ;;  %p237_p8 = scmp.lt.u32.totalorder %s233_s16, %s326_s3 }
 0x10e   :  { %p239_p9 = pnand %p237_p8, %p234_p7 }
 0x110   :  { %242 = shalt.err (!%p239_p9)
}
 0x111   :  { %138 = dma.vmem_to_hbm [thread:$0]  %s136_s12, 128, %s326_s3, [#allocation4]  }
 0x112   :  { %247 = dma.done.wait [#allocation4], 128  }
 0x113   :  { %248 = vsyncadd [#allocation4], 4294967168 }
 0x114   :  { %142 = vsyncpa [#allocation3], 1 }
 0x115   :  { %143 = vsyncpa [#allocation6], 1 }
 0x116   :  { %144 = vsyncpa [#allocation4], 1 }

</bundles_post_ra>
